<compile_context>
chip_gen: v5e
topology: v5e:2x2
jax: 0.10.0
libtpu: 0.0.40
codegen_flags: <defaults>
</compile_context>

<pallas_src>
import functools

import jax
import jax.numpy as jnp
from jax.experimental import pallas as pl
from jax.experimental.pallas import tpu as pltpu


# -----------------------------------------------------------------------------
# Generation-aware sizing helpers
# -----------------------------------------------------------------------------
def _tpu_budgets():
    """Returns (scoped vmem_limit_bytes, per-block byte target), generation-aware."""
    cap = 64 << 20                                    # conservative default (v7x-class)
    try:
        cap = int(getattr(pltpu.get_tpu_info(), "vmem_capacity_bytes", cap))
    except Exception:
        pass
    if cap <= (64 << 20):                             # v7x: 64 MiB physical VMEM per core
        return min(3 * cap // 4, 48 << 20), 2 << 20
    return min(3 * cap // 4, 96 << 20), 4 << 20       # v5e/v6e: 128 MiB physical VMEM


def _pick_block(dim, align, target):
    """Largest legal block size <= target: either the full dim or a multiple of `align`."""
    if dim <= target:
        return dim
    return max(align, (target // align) * align)


def _sigmoid(v):
    # plain VPU/EUP ops; avoids relying on lax.logistic lowering inside the kernel
    return 1.0 / (1.0 + jnp.exp(-v))


# -----------------------------------------------------------------------------
# Fused single-pass kernel: pool -> excitation -> sigmoid -> gate, one slab of x
# -----------------------------------------------------------------------------
def _se_fused_kernel(x_ref, w1_ref, w2_ref, o_ref, *, inv_T):
    # x_ref/o_ref: (b_blk, C, T); w1_ref: (Cr, C); w2_ref: (C, Cr)  (weights resident)
    x = x_ref[...]
    # squeeze: mean over T, accumulated in f32
    pooled = jnp.sum(x, axis=-1, dtype=jnp.float32) * inv_T               # (b_blk, C)
    # excitation: relu(pooled @ W1.T) @ W2.T  (PyTorch Linear weights are (out, in))
    h = jax.lax.dot_general(pooled, w1_ref[...].astype(jnp.float32),
                            (((1,), (1,)), ((), ())),
                            preferred_element_type=jnp.float32)           # (b_blk, Cr)
    h = jnp.maximum(h, 0.0)
    s = jax.lax.dot_general(h, w2_ref[...].astype(jnp.float32),
                            (((1,), (1,)), ((), ())),
                            preferred_element_type=jnp.float32)           # (b_blk, C)
    g = _sigmoid(s).astype(x_ref.dtype)                                   # gate in x.dtype
    # Channel gating.  Garbage rows from a ragged final B tile are discarded by the masked
    # boundary write and never mix into valid rows (all math above is per-(b) row).
    o_ref[...] = (x * g[:, :, None]).astype(o_ref.dtype)


def _se_fused(x, w1, w2, max_bblk, vmem_limit):
    B, C, T = x.shape
    Cr = w1.shape[0]
    # >= 4 parallel grid steps when B allows (keeps both v7x TensorCores busy), VMEM-capped.
    target_steps = min(B, 4)
    b_blk = int(max(1, min(max_bblk, pl.cdiv(B, target_steps))))
    kernel = functools.partial(_se_fused_kernel, inv_T=1.0 / T)
    return pl.pallas_call(
        kernel,
        out_shape=jax.ShapeDtypeStruct((B, C, T), x.dtype),
        grid_spec=pltpu.PrefetchScalarGridSpec(
            num_scalar_prefetch=0,
            grid=(pl.cdiv(B, b_blk),),
            in_specs=[
                pl.BlockSpec((b_blk, C, T), lambda bi: (bi, 0, 0)),
                pl.BlockSpec((Cr, C), lambda bi: (0, 0)),     # resident, fetched once
                pl.BlockSpec((C, Cr), lambda bi: (0, 0)),     # resident, fetched once
            ],
            out_specs=pl.BlockSpec((b_blk, C, T), lambda bi: (bi, 0, 0)),
        ),
        compiler_params=pltpu.CompilerParams(
            dimension_semantics=("parallel",),
            vmem_limit_bytes=int(vmem_limit)),
    )(x, w1, w2)


# -----------------------------------------------------------------------------
# Fallback pass 1: tiled sum over T, accumulated directly in the (B, C) output block
# -----------------------------------------------------------------------------
def _sum_over_t_kernel(x_ref, s_ref, *, T, t_blk):
    # x_ref: (b_blk, C, t_blk); s_ref: (b_blk, C) f32, resident across the T grid axis.
    ti = pl.program_id(1)

    @pl.when(ti == 0)
    def _init():
        s_ref[...] = jnp.zeros_like(s_ref)

    x = x_ref[...]
    if T % t_blk != 0:
        last = pl.num_programs(1) - 1

        # only the ragged final tile pays for iota/compare/select masking
        @pl.when(ti != last)
        def _full_tile():
            s_ref[...] += jnp.sum(x, axis=-1, dtype=jnp.float32)

        @pl.when(ti == last)
        def _ragged_tile():
            col = jax.lax.broadcasted_iota(jnp.int32, x.shape, 2) + ti * t_blk
            xm = jnp.where(col < T, x.astype(jnp.float32), 0.0)
            s_ref[...] += jnp.sum(xm, axis=-1)
    else:
        s_ref[...] += jnp.sum(x, axis=-1, dtype=jnp.float32)


# -----------------------------------------------------------------------------
# Fallback pass 2: out[b, c, t] = x[b, c, t] * gate[b, c]   (gate is 2-D, x.dtype)
# -----------------------------------------------------------------------------
def _gate_kernel(x_ref, g_ref, o_ref):
    # x_ref/o_ref: (b_blk, c_blk, t_blk); g_ref: (b_blk, c_blk), lane-dense
    o_ref[...] = (x_ref[...] * g_ref[...][:, :, None]).astype(o_ref.dtype)


def _se_two_pass(x, w1, w2, vmem_limit, blk_target):
    B, C, T = x.shape
    itemsize = jnp.dtype(x.dtype).itemsize

    # ----- pass 1: tiled sum over T -> (B, C) f32 -----
    if B <= 8:
        b_blk1 = B            # full dim; the (B, C) output sublane rule forbids anything smaller
    else:
        # (B, C) output blocks must keep b_blk1 a multiple of 8; within that, prefer the
        # smallest of: full B, a >= 4-step parallel split, and the per-block byte target.
        cap_bytes = (blk_target // max(1, C * 128 * itemsize)) // 8 * 8
        cap_steps = (pl.cdiv(B, 4) // 8) * 8
        b_blk1 = max(8, min(B // 8 * 8, max(8, cap_bytes), max(8, cap_steps)))
    t_budget = max(128, (blk_target // max(1, b_blk1 * C * itemsize)) // 128 * 128)
    t_blk1 = _pick_block(T, 128, t_budget)

    sums = pl.pallas_call(
        functools.partial(_sum_over_t_kernel, T=T, t_blk=t_blk1),
        out_shape=jax.ShapeDtypeStruct((B, C), jnp.float32),
        grid_spec=pltpu.PrefetchScalarGridSpec(
            num_scalar_prefetch=0,
            grid=(pl.cdiv(B, b_blk1), pl.cdiv(T, t_blk1)),   # reduction axis (T) last
            in_specs=[pl.BlockSpec((b_blk1, C, t_blk1), lambda bi, ti: (bi, 0, ti))],
            out_specs=pl.BlockSpec((b_blk1, C), lambda bi, ti: (bi, 0)),
        ),
        compiler_params=pltpu.CompilerParams(
            dimension_semantics=("parallel", "arbitrary"),
            vmem_limit_bytes=int(vmem_limit)),
    )(x)

    # ----- excitation once over the whole pooled batch (tiny; plain XLA) -----
    pooled = sums * (1.0 / T)                                              # (B, C) f32
    h = jax.lax.dot_general(pooled, w1.astype(jnp.float32), (((1,), (1,)), ((), ())),
                            preferred_element_type=jnp.float32)
    h = jnp.maximum(h, 0.0)
    s = jax.lax.dot_general(h, w2.astype(jnp.float32), (((1,), (1,)), ((), ())),
                            preferred_element_type=jnp.float32)
    gates = _sigmoid(s).astype(x.dtype)                                    # (B, C), x.dtype

    # ----- pass 2: out = x * gates[..., None] with lane-dense streaming tiles -----
    t_blk2 = _pick_block(T, 128, 2048 if blk_target >= (4 << 20) else 1024)
    b_blk2 = min(B, 8)                                        # == B (B < 8) or a multiple of 8
    row_budget = max(8, (blk_target // max(1, b_blk2 * t_blk2 * itemsize)) // 8 * 8)
    c_blk2 = _pick_block(C, 8, row_budget)

    return pl.pallas_call(
        _gate_kernel,
        out_shape=jax.ShapeDtypeStruct((B, C, T), x.dtype),
        grid_spec=pltpu.PrefetchScalarGridSpec(
            num_scalar_prefetch=0,
            grid=(pl.cdiv(B, b_blk2), pl.cdiv(C, c_blk2), pl.cdiv(T, t_blk2)),
            in_specs=[
                pl.BlockSpec((b_blk2, c_blk2, t_blk2), lambda bi, ci, ti: (bi, ci, ti)),
                pl.BlockSpec((b_blk2, c_blk2), lambda bi, ci, ti: (bi, ci)),
            ],
            out_specs=pl.BlockSpec((b_blk2, c_blk2, t_blk2), lambda bi, ci, ti: (bi, ci, ti)),
        ),
        compiler_params=pltpu.CompilerParams(
            dimension_semantics=("parallel", "parallel", "parallel"),
            vmem_limit_bytes=int(vmem_limit)),
    )(x, gates)


# -----------------------------------------------------------------------------
# Public entry point
# -----------------------------------------------------------------------------
def se_attention(x, w1, w2, *, force_two_pass=False):
    """x: (B, C, T); w1: (C//r, C); w2: (C, C//r) -> (B, C, T).  Matches PyTorch SEAttention."""
    B, C, T = x.shape
    Cr = w1.shape[0]
    assert w1.shape == (Cr, C) and w2.shape == (C, Cr), "PyTorch Linear weights are (out, in)"

    vmem_limit, blk_target = _tpu_budgets()
    itemsize = jnp.dtype(x.dtype).itemsize
    slab_bytes = C * T * itemsize                                          # one batch row of x
    w_bytes = (w1.size * jnp.dtype(w1.dtype).itemsize
               + w2.size * jnp.dtype(w2.dtype).itemsize)
    # in + out slabs, each double-buffered, + (double-buffered) resident weights, + headroom
    fused_budget = vmem_limit - 2 * w_bytes - (2 << 20)
    max_bblk = fused_budget // (4 * slab_bytes)

    if max_bblk >= 1 and not force_two_pass:
        return _se_fused(x, w1, w2, max_bblk, vmem_limit)      # 1 read + 1 write of x
    return _se_two_pass(x, w1, w2, vmem_limit, blk_target)     # streaming fallback


def se_attention_ref(x, w1, w2):
    y = jnp.mean(x.astype(jnp.float32), axis=-1)               # (B, C)
    h = jnp.maximum(y @ w1.astype(jnp.float32).T, 0.0)         # (B, C//r)
    s = jax.nn.sigmoid(h @ w2.astype(jnp.float32).T)           # (B, C)
    return (x * s.astype(x.dtype)[:, :, None]).astype(x.dtype)


if __name__ == "__main__":
    B, C, T = 2, 32, 16
    reduction = 16
    Cr = C // reduction

    key = jax.random.PRNGKey(0)
    kx, k1, k2 = jax.random.split(key, 3)
    x = jax.random.normal(kx, (B, C, T), dtype=jnp.float32)
    # deterministic synthetic parameters (PyTorch Linear weight layout: (out, in))
    w1 = jax.random.normal(k1, (Cr, C), dtype=jnp.float32) * (1.0 / jnp.sqrt(C))
    w2 = jax.random.normal(k2, (C, Cr), dtype=jnp.float32) * (1.0 / jnp.sqrt(Cr))

    ref = se_attention_ref(x, w1, w2)

    # fused single-pass path (the one real ECAPA shapes take)
    out_fused = jax.block_until_ready(se_attention(x, w1, w2))
    assert out_fused.shape == (B, C, T)
    assert jnp.allclose(out_fused, ref, atol=1e-5, rtol=1e-5), "fused path mismatch vs reference"

    # also exercise the streaming two-pass fallback once for coverage
    out_two = jax.block_until_ready(se_attention(x, w1, w2, force_two_pass=True))
    assert jnp.allclose(out_two, ref, atol=1e-5, rtol=1e-5), "two-pass path mismatch vs reference"

    print("KERNEL_OK")
</pallas_src>

<mosaic_0001>
module attributes {stable_mosaic.version = 11 : i64} {
  func.func @_se_fused_kernel(%arg0: i32, %arg1: memref<1x32x16xf32, #tpu.memory_space<vmem>>, %arg2: memref<2x32xf32, #tpu.memory_space<vmem>>, %arg3: memref<32x2xf32, #tpu.memory_space<vmem>>, %arg4: memref<1x32x16xf32, #tpu.memory_space<vmem>>) attributes {dimension_semantics = [#tpu.dimension_semantics<parallel>], iteration_bounds = array<i64: 2>, scalar_prefetch = 0 : i64, scratch_operands = 0 : i64, tpu.core_type = #tpu.core_type<tc>, window_params = [{transform_indices = @transform_0, window_bounds = array<i64: 1, 32, 16>}, {pipeline_mode = #tpu.pipeline_mode<synchronous>, transform_indices = @transform_1, window_bounds = array<i64: 2, 32>}, {pipeline_mode = #tpu.pipeline_mode<synchronous>, transform_indices = @transform_2, window_bounds = array<i64: 32, 2>}, {transform_indices = @transform_3, window_bounds = array<i64: 1, 32, 16>}]} {
    %c0 = arith.constant 0 : index
    %c0_0 = arith.constant 0 : index
    %c0_1 = arith.constant 0 : index
    %0 = vector.load %arg1[%c0, %c0_0, %c0_1] : memref<1x32x16xf32, #tpu.memory_space<vmem>>, vector<1x32x16xf32>
    %cst = arith.constant dense<0.000000e+00> : vector<1x32xf32>
    %1 = vector.multi_reduction <add>, %0, %cst [2] : vector<1x32x16xf32> to vector<1x32xf32>
    %cst_2 = arith.constant 6.250000e-02 : f32
    %2 = vector.broadcast %cst_2 : f32 to vector<1x32xf32>
    %3 = arith.mulf %1, %2 : vector<1x32xf32>
    %c0_3 = arith.constant 0 : index
    %c0_4 = arith.constant 0 : index
    %4 = vector.load %arg2[%c0_3, %c0_4] : memref<2x32xf32, #tpu.memory_space<vmem>>, vector<2x32xf32>
    %cst_5 = arith.constant dense<0.000000e+00> : vector<1x2xf32>
    %5 = tpu.matmul %3, %4, %cst_5 {dimension_numbers = #tpu.dot_dimension_numbers<[1], [1], [0], [0], [0, 0, 1, 0], [], []>} : vector<1x32xf32>, vector<2x32xf32>, vector<1x2xf32> -> vector<1x2xf32>
    %cst_6 = arith.constant 0.000000e+00 : f32
    %6 = vector.broadcast %cst_6 : f32 to vector<1x2xf32>
    %7 = arith.maximumf %5, %6 : vector<1x2xf32>
    %c0_7 = arith.constant 0 : index
    %c0_8 = arith.constant 0 : index
    %8 = vector.load %arg3[%c0_7, %c0_8] : memref<32x2xf32, #tpu.memory_space<vmem>>, vector<32x2xf32>
    %cst_9 = arith.constant dense<0.000000e+00> : vector<1x32xf32>
    %9 = tpu.matmul %7, %8, %cst_9 {dimension_numbers = #tpu.dot_dimension_numbers<[1], [1], [0], [0], [0, 0, 1, 0], [], []>} : vector<1x2xf32>, vector<32x2xf32>, vector<1x32xf32> -> vector<1x32xf32>
    %cst_10 = arith.constant 0.000000e+00 : f32
    %10 = vector.broadcast %cst_10 : f32 to vector<1x32xf32>
    %11 = arith.subf %10, %9 : vector<1x32xf32>
    %12 = math.exp %11 : vector<1x32xf32>
    %cst_11 = arith.constant 1.000000e+00 : f32
    %13 = vector.broadcast %cst_11 : f32 to vector<1x32xf32>
    %14 = arith.addf %13, %12 : vector<1x32xf32>
    %cst_12 = arith.constant 1.000000e+00 : f32
    %15 = vector.broadcast %cst_12 : f32 to vector<1x32xf32>
    %16 = arith.divf %15, %14 : vector<1x32xf32>
    %17 = vector.shape_cast %16 : vector<1x32xf32> to vector<1x32x1xf32>
    %18 = vector.broadcast %17 : vector<1x32x1xf32> to vector<1x32x16xf32>
    %19 = arith.mulf %0, %18 : vector<1x32x16xf32>
    %c0_13 = arith.constant 0 : index
    %c0_14 = arith.constant 0 : index
    %c0_15 = arith.constant 0 : index
    %20 = vector.load %arg4[%c0_13, %c0_14, %c0_15] : memref<1x32x16xf32, #tpu.memory_space<vmem>>, vector<1x32x16xf32>
    tpu.vector_store %arg4[%c0_13, %c0_14, %c0_15], %19 {strides = array<i32>} : memref<1x32x16xf32, #tpu.memory_space<vmem>>, vector<1x32x16xf32>,
    return
  }
  func.func @transform_0(%arg0: i32) -> (i32, i32, i32) {
    %c0_i32 = arith.constant 0 : i32
    %c0_i32_0 = arith.constant 0 : i32
    %c0_i32_1 = arith.constant 0 : i32
    return %arg0, %c0_i32, %c0_i32_0 : i32, i32, i32
  }
  func.func @transform_1(%arg0: i32) -> (i32, i32) {
    %c0_i32 = arith.constant 0 : i32
    %c0_i32_0 = arith.constant 0 : i32
    %c0_i32_1 = arith.constant 0 : i32
    return %c0_i32, %c0_i32_0 : i32, i32
  }
  func.func @transform_2(%arg0: i32) -> (i32, i32) {
    %c0_i32 = arith.constant 0 : i32
    %c0_i32_0 = arith.constant 0 : i32
    %c0_i32_1 = arith.constant 0 : i32
    return %c0_i32, %c0_i32_0 : i32, i32
  }
  func.func @transform_3(%arg0: i32) -> (i32, i32, i32) {
    %c0_i32 = arith.constant 0 : i32
    %c0_i32_0 = arith.constant 0 : i32
    %c0_i32_1 = arith.constant 0 : i32
    return %arg0, %c0_i32, %c0_i32_0 : i32, i32, i32
  }
}

</mosaic_0001>

<bundles_post_ra>
// kernel: tpu_custom_call.1
= control target key start
LH: loop header
LB: loop body
LE: loop exit
PB: predicated region body
PF: predicated region fallthrough
CT: control target
= control target key end

     0   :  { %s451_s12 = smov 0   ;;  %s521_s0 = inlined_call_operand.vmem [shape: f32[2,32,16], index: 0, kind: input, shape index: {}]   ;;  %s522_s1 = inlined_call_operand.vmem [shape: f32[2,32], index: 1, kind: input, shape index: {}]   ;;  %s523_s2 = inlined_call_operand.vmem [shape: f32[32,2], index: 2, kind: input, shape index: {}]   ;;  %s524_s3 = inlined_call_operand.vmem [shape: f32[2,32,16], index: 3, kind: output, shape index: {}]  }
   0x1 LB: > { %s386_s13 = sadd.s32 4294967295, %s429_s12   ;;  %p390_p0 = scmp.ge.s32.totalorder %s429_s12, 1  ;;  %s429_s12 = sphi %s451_s12, %s13_s12  }
   0x2   : > { %p137_p1 = scmp.lt.s32.totalorder %s429_s12, 3 }
   0x4   : > { %p138_p2 = pnand %p390_p0, %p137_p1 }
   0x5   : > { %p161_p3 = scmp.lt.s32.totalorder (!%p138_p2), %s386_s13, 1 }
   0x6   : > { %141 = sbr.rel (%p138_p2) target bundleno = 552 (0x228), region = 32 }
   0xb   : > { %s526_s13 = smov (!%p161_p3, %s386_s13), 1  ;;  %vm175_vm0 = vcmask 130048   ;;  %v192_v8 = vld [vmem:[%s522_s1] sm:$0x3]  ;;  %vm212_vm1 = vcmask 261120   ;;  %v242_v9 = vld [vmem:[%s523_s2 + $0x18] sm:$0xff]  ;;  %v197_v12 = vlaneseq }
   0xc   : > { %s404_s14 = sshll.u32 %s526_s13, 5  ;;  %395 = vmatpush.xpose.msk.msra.mxu0 %vm212_vm1, %v192_v8  ;;  %vm243_vm2 = vcmask 15360   ;;  %v241_v10 = vld [vmem:[%s523_s2 + $0x10] sm:$0xff]  ;;  %v240_v11 = vld [vmem:[%s523_s2 + $0x8] sm:$0xff]  ;;  %vm202_vm3 = vcmask 130112   ;;  %vm206_vm4 = vcmask 195712  }
   0xd   : > { %s165_s17 = scalar_lea.vmem %s521_s0, %s404_s14  ;;  %397 = vmatpush.xpose.msk.msra.mxu1 %vm243_vm2, %v242_v9  ;;  %v198_v15 = vand.u32 127, %v197_v12  ;;  %vm210_vm5 = vcmask 261312   ;;  %v239_v32 = vld [vmem:[%s523_s2] sm:$0xff]  ;;  %v300_v35 = vshrl.u32 %v197_v12, 7  ;;  %s170_s30 = scalar_lea.vmem %s524_s3, %s404_s14 }
   0xe   : > { %v467_v0 = vld [vmem:[%s165_s17] sm:$0xff]  ;;  %v469_v1 = vld [vmem:[%s165_s17 + $0x10] sm:$0xff]  ;;  %v475_v4 = vld [vmem:[%s165_s17 + $0x8] sm:$0xff] }
   0xf   : > { %v176_v2 = vsel %vm175_vm0, %v467_v0, 0.0  ;;  %v182_v3 = vsel %vm175_vm0, %v469_v1, 0.0  ;;  %v477_v5 = vld [vmem:[%s165_s17 + $0x18] sm:$0xff]  ;;  %v179_v6 = vsel %vm175_vm0, %v475_v4, 0.0  ;;  %v200_v17 = vadd.s32 4294967288, %v198_v15  ;;  %414 = vset.pattern.permute.xlu2 %v300_v35 }
  0x10   : > { %177 = vadd.xlane.f32.xlu0 %v176_v2  ;;  %183 = vadd.xlane.f32.xlu1 %v182_v3  ;;  %v185_v7 = vsel %vm175_vm0, %v477_v5, 0.0  ;;  %v208_v18 = vadd.s32 4294967272, %v198_v15  ;;  %v204_v19 = vadd.s32 4294967280, %v198_v15  ;;  %v319_v36 = vadd.s32 24, %v300_v35 }
  0x11   : > { %398 = vmatpush.xpose.msk.msra.mxu1 %vm243_vm2, %v241_v10  ;;  %v313_v37 = vadd.s32 16, %v300_v35  ;;  %v307_v54 = vadd.s32 8, %v300_v35 }
  0x12   : > { %417 = vset.pattern.permute.xlu1 %v319_v36 }
  0x13   : > { %416 = vset.pattern.permute.xlu0 %v313_v37 }
  0x15   : > { %399 = vmatpush.xpose.msk.msra.mxu1 %vm243_vm2, %v240_v11 }
  0x18   : > { %180 = vadd.xlane.f32.xlu0 %v179_v6  ;;  %186 = vadd.xlane.f32.xlu1 %v185_v7 }
  0x19   : > { %400 = vmatpush.xpose.msk.msra.mxu1 %vm243_vm2, %v239_v32 }
  0x83   : > { %v178_v13 = vpop.xlane.xlu0 %177  ;;  %v184_v14 = vpop.xlane.xlu1 %183 }
  0x84   : > { %v188_v16 = vmul.f32 0.0625, %v178_v13  ;;  %v190_v20 = vmul.f32 0.0625, %v184_v14 }
  0x86   : > { %v199_v25 = vperm.slane %v188_v16, %v198_v15  ;;  %v205_v28 = vperm.slane %v190_v20, %v204_v19 }
  0x8b   : > { %v181_v21 = vpop.xlane.xlu0 %180  ;;  %v187_v22 = vpop.xlane.xlu1 %186 }
  0x8c   : > { %v189_v23 = vmul.f32 0.0625, %v181_v21  ;;  %v191_v24 = vmul.f32 0.0625, %v187_v22 }
  0x8e   : > { %v201_v26 = vperm.slane %v189_v23, %v200_v17  ;;  %v209_v27 = vperm.slane %v191_v24, %v208_v18 }
  0x90   : > { %v203_v29 = vsel %vm202_vm3, %v201_v26, %v199_v25 }
  0x91   : > { %v207_v30 = vsel %vm206_vm4, %v205_v28, %v203_v29 }
  0x92   : > { %v211_v31 = vsel %vm210_vm5, %v209_v27, %v207_v30 }
  0x93   : > { %396 = vmatmul.msk.f32.vlgmr.msra.gmra.mxu0 %vm212_vm1, %v211_v31 }
 0x110   : > { %v235_v33 = vpop.f32.mrf.mxu0 }
 0x111   : > { %v238_v34 = vmax.f32 %v235_v33, 0.0 }
 0x113   : > { %401 = vmatmul.msk.f32.vlgmr.msra.gmra.mxu1 %vm243_vm2, %v238_v34 }
 0x190   : > { %v276_v38 = vpop.f32.mrf.mxu1 }
 0x191   : > { %v279_v39 = vsub.f32 0.0, %v276_v38 }
 0x193   : > { %v280_v40 = vmul.f32 1.442695, %v279_v39 }
 0x195   : > { %419 = vpow2.f32 %v280_v40 }
 0x19b   : > { %v420_v41 = vpop.eup %419 }
 0x19c   : > { %v282_v42 = vadd.f32 1.0, %v420_v41 }
 0x19e   : > { %421 = vrcp.f32 %v282_v42  ;;  %v294_v46 = vand.u32 2147483648, %v282_v42  ;;  %v292_v48 = vand.u32 2147483647, %v282_v42  ;;  %vm288_vm7 = vweird.f32 %v282_v42 }
 0x1a0   : > { %v295_v50 = vor.u32 1.1754944e-38, %v294_v46  ;;  %vm293_vm9 = vcmp.eq.f32.partialorder %v292_v48, 8.507059e+37 }
 0x1a4   : > { %v422_v43 = vpop.eup %421 }
 0x1a5   : > { %v284_v44 = vmul.f32 %v422_v43, %v282_v42  ;;  %vm289_vm6 = vweird.f32 %v422_v43 }
 0x1a6   : > { %vm290_vm8 = vmor %vm288_vm7, %vm289_vm6 }
 0x1a7   : > { %v285_v45 = vsub.f32 1.0, %v284_v44 }
 0x1a9   : > { %v286_v47 = vmul.f32 %v422_v43, %v285_v45 }
 0x1ab   : > { %v287_v49 = vadd.f32 %v422_v43, %v286_v47 }
 0x1ad   : > { %v291_v51 = vsel %vm290_vm8, %v422_v43, %v287_v49 }
 0x1ae   : > { %v296_v52 = vsel %vm293_vm9, %v295_v50, %v291_v51 }
 0x1af   : > { %v298_v53 = vperm.slane %v296_v52, 0 }
 0x1b1   : > { %321 = vperm.xlu1 %417, %v298_v53   ;;  %315 = vperm.xlu0 %416, %v298_v53  }
 0x1b2   : > { %303 = vperm.xlu2 %414, %v298_v53  }
 0x1b9   : > { %418 = vset.pattern.permute.xlu0 %v319_v36 }
 0x1ba   : > { %415 = vset.pattern.permute.xlu2 %v307_v54 }
 0x1c2   : > { %309 = vperm.xlu2 %415, %v298_v53  }
 0x20c   : > { %v304_v55 = vpop.permute.xlu2 %303 }
 0x20d   : > { %v323_v56 = vmul.f32 %v304_v55, %v467_v0 }
 0x20f   : > { %327 = vst.msk [vmem:[%s170_s30] sm:$0xff] %vm175_vm0, %v323_v56 }
 0x21c   : > { %v310_v57 = vpop.permute.xlu2 %309 }
 0x21d   : > { %v324_v58 = vmul.f32 %v310_v57, %v475_v4 }
 0x21f   : > { %328 = vst.msk [vmem:[%s170_s30 + $0x8] sm:$0xff] %vm175_vm0, %v324_v58 }
 0x223   : > { %v322_v59 = vpop.permute.xlu1 %321  ;;  %v316_v60 = vpop.permute.xlu0 %315 }
 0x224   : > { %v326_v61 = vmul.f32 %v322_v59, %v477_v5  ;;  %v325_v62 = vmul.f32 %v316_v60, %v469_v1 }
 0x226   : > { %330 = vst.msk [vmem:[%s170_s30 + $0x18] sm:$0xff] %vm175_vm0, %v326_v61 }
 0x227   : > { %329 = vst.msk [vmem:[%s170_s30 + $0x10] sm:$0xff] %vm175_vm0, %v325_v62 }
 0x228 PF: > { %s13_s12 = sadd.s32 1, %s429_s12  }
 0x229   : > { %p10_p4 = scmp.ge.s32.totalorder %s13_s12, 4  }
 0x22b   :  { %12 = sbr.rel (!%p10_p4) target bundleno = 1 (0x1), region = 62 }

</bundles_post_ra>
